<compile_context>
chip_gen: v6e
topology: v6e:2x2x1
jax: 0.10.0
libtpu: 0.0.40
codegen_flags: <defaults>
</compile_context>

<pallas_src>
import jax
import jax.numpy as jnp
from jax.experimental import pallas as pl
from jax.experimental.pallas import tpu as pltpu


def _round_up(x, m):
    return ((x + m - 1) // m) * m


def _pad2d(x, rows, cols, dtype):
    """Zero-pad/cast a 2-D array; no-op (no HBM round trip) if already OK."""
    r, c = x.shape
    if (r, c) == (rows, cols) and x.dtype == jnp.dtype(dtype):
        return x
    out = jnp.zeros((rows, cols), dtype)
    return out.at[:r, :c].set(x.astype(dtype))


def _decoder_kernel(hr_ref, w_ref, hd_ref, o_ref, supp_ref):
    # supp1 tile = HR_i @ W, computed once per row tile (j == 0) and cached in
    # VMEM scratch so it is reused by every column tile of the same row tile.
    @pl.when(pl.program_id(1) == 0)
    def _():
        supp_ref[...] = jnp.dot(
            hr_ref[...], w_ref[...],
            preferred_element_type=jnp.float32).astype(supp_ref.dtype)

    # decoder tile = supp1 @ HD_j^T: contract the feature axis of both
    # operands so the wrapper never materializes HD.T in HBM.
    out = jax.lax.dot_general(
        supp_ref[...], hd_ref[...],
        dimension_numbers=(((1,), (1,)), ((), ())),
        preferred_element_type=jnp.float32)
    o_ref[...] = out.astype(o_ref.dtype)


def decoder_forward(H, train_W, drug_num, target_num, *,
                    compute_dtype=jnp.float32, out_dtype=jnp.float32,
                    tm_max=256, tn_max=512, single_buffer_w=True):
    """Fused Decoder forward: (H[:D] @ W) @ H[D:D+T].T  -> [D, T]."""
    feat = H.shape[1]
    assert train_W.shape == (feat, feat)

    HR = H[:drug_num]                              # [D, F]
    HD = H[drug_num:drug_num + target_num]         # [T, F]

    in_item = jnp.dtype(compute_dtype).itemsize
    out_item = jnp.dtype(out_dtype).itemsize
    row_align = {1: 32, 2: 16, 4: 8}.get(in_item, 8)

    # Lane-dense contraction axis (zero-pad keeps the math exact).
    f_pad = _round_up(feat, 128)

    # Balanced tiles: split into cdiv(D, tm_max) chunks instead of padding D
    # up to a fixed tile -> over-padding is at most one sublane group.
    grid_m = pl.cdiv(drug_num, tm_max)
    tm = _round_up(pl.cdiv(drug_num, grid_m), row_align)
    grid_n = pl.cdiv(target_num, tn_max)
    tn = _round_up(pl.cdiv(target_num, grid_n), 128)

    # Per-step VMEM budget (conservatively assume double-buffering everywhere)
    # so the same tiling fits v7x's 64 MiB physical VMEM.
    def vmem_est(tm_, tn_):
        return ((2 * tm_ * f_pad + 2 * f_pad * f_pad + 2 * tn_ * f_pad) * in_item
                + 2 * tm_ * tn_ * out_item          # output tiles
                + tm_ * f_pad * in_item)            # supp1 scratch
    budget = 40 * 2**20
    while vmem_est(tm, tn) > budget and tn > 128:
        tn = max(128, _round_up(tn // 2, 128))
    while vmem_est(tm, tn) > budget and tm > row_align:
        tm = max(row_align, _round_up(tm // 2, row_align))
    # TODO(synk): for feat >~ 2K add a K ("arbitrary", last) grid axis that
    # streams slabs of W / HD with an f32 VMEM accumulator instead of keeping
    # the full W resident.

    d_pad = _round_up(drug_num, tm)
    t_pad = _round_up(target_num, tn)

    hr = _pad2d(HR, d_pad, f_pad, compute_dtype)
    w = _pad2d(train_W, f_pad, f_pad, compute_dtype)
    hd = _pad2d(HD, t_pad, f_pad, compute_dtype)

    cost = pl.CostEstimate(
        flops=2 * d_pad * f_pad * f_pad + 2 * d_pad * f_pad * t_pad,
        transcendentals=0,
        bytes_accessed=(hr.size + w.size + hd.size) * in_item
        + d_pad * t_pad * out_item,
    )
    vmem_limit = int(min(max(vmem_est(tm, tn) + 8 * 2**20, 32 * 2**20),
                         48 * 2**20))

    def run(w_spec):
        return pl.pallas_call(
            _decoder_kernel,
            out_shape=jax.ShapeDtypeStruct((d_pad, t_pad), out_dtype),
            grid_spec=pltpu.PrefetchScalarGridSpec(
                num_scalar_prefetch=0,
                grid=(d_pad // tm, t_pad // tn),
                in_specs=[
                    pl.BlockSpec((tm, f_pad), lambda i, j: (i, 0)),   # HR rows
                    w_spec,                                           # W
                    pl.BlockSpec((tn, f_pad), lambda i, j: (j, 0)),   # HD rows
                ],
                out_specs=pl.BlockSpec((tm, tn), lambda i, j: (i, j)),
                scratch_shapes=[pltpu.VMEM((tm, f_pad), compute_dtype)],
            ),
            compiler_params=pltpu.CompilerParams(
                dimension_semantics=("parallel", "arbitrary"),
                vmem_limit_bytes=vmem_limit),
            cost_estimate=cost,
        )(hr, w, hd)

    if single_buffer_w:
        try:
            # W never changes across the grid -> a single VMEM buffer suffices.
            w_spec = pl.BlockSpec((f_pad, f_pad), lambda i, j: (0, 0),
                                  pipeline_mode=pl.Buffered(1))
            out_pad = run(w_spec)
        except Exception:
            # pipeline_mode not supported on this jax version/path: fall back
            # to the default (double-buffered) resident spec.
            out_pad = run(pl.BlockSpec((f_pad, f_pad), lambda i, j: (0, 0)))
    else:
        out_pad = run(pl.BlockSpec((f_pad, f_pad), lambda i, j: (0, 0)))

    return out_pad[:drug_num, :target_num]


if __name__ == "__main__":
    # Small shapes consistent with the module's forward:
    #   drug_num = 64, target_num = 48, feature dim = 32, H = [112, 32]
    DRUG_NUM, TARGET_NUM, FEAT = 64, 48, 32

    key = jax.random.PRNGKey(0)
    kh, kw = jax.random.split(key)

    H = jax.random.normal(kh, (DRUG_NUM + TARGET_NUM, FEAT), dtype=jnp.float32)
    xavier_std = (2.0 / (FEAT + FEAT)) ** 0.5
    train_W = xavier_std * jax.random.normal(kw, (FEAT, FEAT), dtype=jnp.float32)

    HR = H[:DRUG_NUM]
    HD = H[DRUG_NUM:DRUG_NUM + TARGET_NUM]

    # --- Default (float32) path: matches the PyTorch module's precision. ---
    out = decoder_forward(H, train_W, DRUG_NUM, TARGET_NUM)
    out = jax.block_until_ready(out)

    ref = jnp.dot(jnp.dot(HR, train_W, precision=jax.lax.Precision.HIGHEST),
                  HD.T, precision=jax.lax.Precision.HIGHEST)
    assert out.shape == (DRUG_NUM, TARGET_NUM)
    assert jnp.allclose(out, ref, atol=1e-3, rtol=1e-3)

    # --- Optional fast bf16-MXU path (single rounding of supp1). ---
    out_bf16 = decoder_forward(H, train_W, DRUG_NUM, TARGET_NUM,
                               compute_dtype=jnp.bfloat16)
    out_bf16 = jax.block_until_ready(out_bf16)

    supp_bf = jnp.dot(HR.astype(jnp.bfloat16), train_W.astype(jnp.bfloat16),
                      preferred_element_type=jnp.float32).astype(jnp.bfloat16)
    ref_bf = jax.lax.dot_general(supp_bf, HD.astype(jnp.bfloat16),
                                 (((1,), (1,)), ((), ())),
                                 preferred_element_type=jnp.float32)
    assert jnp.allclose(out_bf16, ref_bf, atol=2e-2, rtol=2e-2)

    print("KERNEL_OK")
</pallas_src>

<mosaic_0001>
module attributes {stable_mosaic.version = 11 : i64} {
  func.func @_decoder_kernel(%arg0: i32, %arg1: i32, %arg2: memref<64x128xf32, #tpu.memory_space<vmem>>, %arg3: memref<128x128xf32, #tpu.memory_space<vmem>>, %arg4: memref<128x128xf32, #tpu.memory_space<vmem>>, %arg5: memref<64x128xf32, #tpu.memory_space<vmem>>, %arg6: memref<64x128xf32, #tpu.memory_space<vmem>>) attributes {dimension_semantics = [#tpu.dimension_semantics<parallel>, #tpu.dimension_semantics<arbitrary>], iteration_bounds = array<i64: 1, 1>, scalar_prefetch = 0 : i64, scratch_operands = 1 : i64, tpu.core_type = #tpu.core_type<tc>, window_params = [{transform_indices = @transform_0, window_bounds = array<i64: 64, 128>}, {pipeline_mode = #tpu.pipeline_mode<synchronous>, transform_indices = @transform_1, window_bounds = array<i64: 128, 128>}, {transform_indices = @transform_2, window_bounds = array<i64: 128, 128>}, {transform_indices = @transform_3, window_bounds = array<i64: 64, 128>}]} {
    %c0_i32 = arith.constant 0 : i32
    %0 = arith.cmpi eq, %arg1, %c0_i32 : i32
    %1 = arith.extui %0 : i1 to i32
    %c0_i32_0 = arith.constant 0 : i32
    %2 = arith.cmpi ne, %1, %c0_i32_0 : i32
    scf.if %2 {
      %c0_6 = arith.constant 0 : index
      %c0_7 = arith.constant 0 : index
      %7 = vector.load %arg2[%c0_6, %c0_7] : memref<64x128xf32, #tpu.memory_space<vmem>>, vector<64x128xf32>
      %c0_8 = arith.constant 0 : index
      %c0_9 = arith.constant 0 : index
      %8 = vector.load %arg3[%c0_8, %c0_9] : memref<128x128xf32, #tpu.memory_space<vmem>>, vector<128x128xf32>
      %cst_10 = arith.constant dense<0.000000e+00> : vector<64x128xf32>
      %9 = tpu.matmul %7, %8, %cst_10 {dimension_numbers = #tpu.dot_dimension_numbers<[1], [0], [0], [1], [0, 0, 1, 1], [], []>} : vector<64x128xf32>, vector<128x128xf32>, vector<64x128xf32> -> vector<64x128xf32>
      %c0_11 = arith.constant 0 : index
      %c0_12 = arith.constant 0 : index
      %10 = vector.load %arg6[%c0_11, %c0_12] : memref<64x128xf32, #tpu.memory_space<vmem>>, vector<64x128xf32>
      tpu.vector_store %arg6[%c0_11, %c0_12], %9 {strides = array<i32>} : memref<64x128xf32, #tpu.memory_space<vmem>>, vector<64x128xf32>,
    } else {
    }
    %c0 = arith.constant 0 : index
    %c0_1 = arith.constant 0 : index
    %3 = vector.load %arg6[%c0, %c0_1] : memref<64x128xf32, #tpu.memory_space<vmem>>, vector<64x128xf32>
    %c0_2 = arith.constant 0 : index
    %c0_3 = arith.constant 0 : index
    %4 = vector.load %arg4[%c0_2, %c0_3] : memref<128x128xf32, #tpu.memory_space<vmem>>, vector<128x128xf32>
    %cst = arith.constant dense<0.000000e+00> : vector<64x128xf32>
    %5 = tpu.matmul %3, %4, %cst {dimension_numbers = #tpu.dot_dimension_numbers<[1], [1], [0], [0], [0, 0, 1, 0], [], []>} : vector<64x128xf32>, vector<128x128xf32>, vector<64x128xf32> -> vector<64x128xf32>
    %c0_4 = arith.constant 0 : index
    %c0_5 = arith.constant 0 : index
    %6 = vector.load %arg5[%c0_4, %c0_5] : memref<64x128xf32, #tpu.memory_space<vmem>>, vector<64x128xf32>
    tpu.vector_store %arg5[%c0_4, %c0_5], %5 {strides = array<i32>} : memref<64x128xf32, #tpu.memory_space<vmem>>, vector<64x128xf32>,
    return
  }
  func.func @transform_0(%arg0: i32, %arg1: i32) -> (i32, i32) {
    %c0_i32 = arith.constant 0 : i32
    %c0_i32_0 = arith.constant 0 : i32
    return %arg0, %c0_i32 : i32, i32
  }
  func.func @transform_1(%arg0: i32, %arg1: i32) -> (i32, i32) {
    %c0_i32 = arith.constant 0 : i32
    %c0_i32_0 = arith.constant 0 : i32
    %c0_i32_1 = arith.constant 0 : i32
    return %c0_i32, %c0_i32_0 : i32, i32
  }
  func.func @transform_2(%arg0: i32, %arg1: i32) -> (i32, i32) {
    %c0_i32 = arith.constant 0 : i32
    %c0_i32_0 = arith.constant 0 : i32
    return %arg1, %c0_i32 : i32, i32
  }
  func.func @transform_3(%arg0: i32, %arg1: i32) -> (i32, i32) {
    %c0_i32 = arith.constant 0 : i32
    return %arg0, %arg1 : i32, i32
  }
}

module attributes {stable_mosaic.version = 11 : i64} {
  func.func @_decoder_kernel(%arg0: i32, %arg1: i32, %arg2: memref<64x128xf32, #tpu.memory_space<vmem>>, %arg3: memref<128x128xf32, #tpu.memory_space<vmem>>, %arg4: memref<128x128xf32, #tpu.memory_space<vmem>>, %arg5: memref<64x128xf32, #tpu.memory_space<vmem>>, %arg6: memref<64x128xf32, #tpu.memory_space<vmem>>) attributes {dimension_semantics = [#tpu.dimension_semantics<parallel>, #tpu.dimension_semantics<arbitrary>], iteration_bounds = array<i64: 1, 1>, scalar_prefetch = 0 : i64, scratch_operands = 1 : i64, tpu.core_type = #tpu.core_type<tc>, window_params = [{transform_indices = @transform_0, window_bounds = array<i64: 64, 128>}, {pipeline_mode = #tpu.pipeline_mode<synchronous>, transform_indices = @transform_1, window_bounds = array<i64: 128, 128>}, {transform_indices = @transform_2, window_bounds = array<i64: 128, 128>}, {transform_indices = @transform_3, window_bounds = array<i64: 64, 128>}]} {
    %c0_i32 = arith.constant 0 : i32
    %0 = arith.cmpi eq, %arg1, %c0_i32 : i32
    %1 = arith.extui %0 : i1 to i32
    %c0_i32_0 = arith.constant 0 : i32
    %2 = arith.cmpi ne, %1, %c0_i32_0 : i32
    scf.if %2 {
      %c0_6 = arith.constant 0 : index
      %c0_7 = arith.constant 0 : index
      %7 = vector.load %arg2[%c0_6, %c0_7] : memref<64x128xf32, #tpu.memory_space<vmem>>, vector<64x128xf32>
      %c0_8 = arith.constant 0 : index
      %c0_9 = arith.constant 0 : index
      %8 = vector.load %arg3[%c0_8, %c0_9] : memref<128x128xf32, #tpu.memory_space<vmem>>, vector<128x128xf32>
      %cst_10 = arith.constant dense<0.000000e+00> : vector<64x128xf32>
      %9 = tpu.matmul %7, %8, %cst_10 {dimension_numbers = #tpu.dot_dimension_numbers<[1], [0], [0], [1], [0, 0, 1, 1], [], []>} : vector<64x128xf32>, vector<128x128xf32>, vector<64x128xf32> -> vector<64x128xf32>
      %c0_11 = arith.constant 0 : index
      %c0_12 = arith.constant 0 : index
      %10 = vector.load %arg6[%c0_11, %c0_12] : memref<64x128xf32, #tpu.memory_space<vmem>>, vector<64x128xf32>
      tpu.vector_store %arg6[%c0_11, %c0_12], %9 {strides = array<i32>} : memref<64x128xf32, #tpu.memory_space<vmem>>, vector<64x128xf32>,
    } else {
    }
    %c0 = arith.constant 0 : index
    %c0_1 = arith.constant 0 : index
    %3 = vector.load %arg6[%c0, %c0_1] : memref<64x128xf32, #tpu.memory_space<vmem>>, vector<64x128xf32>
    %c0_2 = arith.constant 0 : index
    %c0_3 = arith.constant 0 : index
    %4 = vector.load %arg4[%c0_2, %c0_3] : memref<128x128xf32, #tpu.memory_space<vmem>>, vector<128x128xf32>
    %cst = arith.constant dense<0.000000e+00> : vector<64x128xf32>
    %5 = tpu.matmul %3, %4, %cst {dimension_numbers = #tpu.dot_dimension_numbers<[1], [1], [0], [0], [0, 0, 1, 0], [], []>} : vector<64x128xf32>, vector<128x128xf32>, vector<64x128xf32> -> vector<64x128xf32>
    %c0_4 = arith.constant 0 : index
    %c0_5 = arith.constant 0 : index
    %6 = vector.load %arg5[%c0_4, %c0_5] : memref<64x128xf32, #tpu.memory_space<vmem>>, vector<64x128xf32>
    tpu.vector_store %arg5[%c0_4, %c0_5], %5 {strides = array<i32>} : memref<64x128xf32, #tpu.memory_space<vmem>>, vector<64x128xf32>,
    return
  }
  func.func @transform_0(%arg0: i32, %arg1: i32) -> (i32, i32) {
    %c0_i32 = arith.constant 0 : i32
    %c0_i32_0 = arith.constant 0 : i32
    return %arg0, %c0_i32 : i32, i32
  }
  func.func @transform_1(%arg0: i32, %arg1: i32) -> (i32, i32) {
    %c0_i32 = arith.constant 0 : i32
    %c0_i32_0 = arith.constant 0 : i32
    %c0_i32_1 = arith.constant 0 : i32
    return %c0_i32, %c0_i32_0 : i32, i32
  }
  func.func @transform_2(%arg0: i32, %arg1: i32) -> (i32, i32) {
    %c0_i32 = arith.constant 0 : i32
    %c0_i32_0 = arith.constant 0 : i32
    return %arg1, %c0_i32 : i32, i32
  }
  func.func @transform_3(%arg0: i32, %arg1: i32) -> (i32, i32) {
    %c0_i32 = arith.constant 0 : i32
    return %arg0, %arg1 : i32, i32
  }
}

</mosaic_0001>

<bundles_post_ra>
// kernel: tpu_custom_call.1
= control target key start
LH: loop header
LB: loop body
LE: loop exit
PB: predicated region body
PF: predicated region fallthrough
CT: control target
= control target key end

     0   :  { %8 = vsyncpa [#allocation4], 0  ;;  %s630_s0 = inlined_call_operand.hbm [shape: f32[64,128], index: 0, kind: input, shape index: {}]   ;;  %s631_s1 = inlined_call_operand.hbm [shape: f32[128,128], index: 1, kind: input, shape index: {}]   ;;  %s632_s2 = inlined_call_operand.hbm [shape: f32[128,128], index: 2, kind: input, shape index: {}]   ;;  %s633_s3 = inlined_call_operand.hbm [shape: f32[64,128], index: 3, kind: output, shape index: {}]  }
   0x1   :  { %9 = vsyncpa [#allocation7], 0 }
   0x2   :  { %10 = vsyncpa [#allocation5], 0  ;;  %s580_s12 = smov [#allocation6]   ;;  %s581_s14 = smov [#allocation3]  }
   0x3   :  { %s28_s13 = sshll.u32 %s580_s12, 4  ;;  %s16_s15 = sshll.u32 %s581_s14, 4  ;;  %s29_s13 = int_to_ptr.vmem [resolvable:$true] %s28_s13  ;;  %s17_s15 = int_to_ptr.vmem [resolvable:$true] %s16_s15 }
   0x4   :  { %s502_s16 = scalar_lea.vmem %s29_s13, 2048  ;;  %p507_p1 = scmp.lt.s32.totalorder %s29_s13, %s29_s13 }
   0x5   :  { %p503_p0 = scmp.ne.s32.totalorder %s29_s13, %s502_s16  ;;  %p508_p2 = scmp.lt.s32.totalorder %s502_s16, %s502_s16 }
   0x7   :  { %p509_p3 = por %p508_p2, %p507_p1 }
   0x9   :  { %p510_p4 = pnand %p509_p3, %p503_p0 }
   0xb   :  { %513 = shalt.err (!%p510_p4)
}
   0xc   :  { %s582_s17 = smov 128   ;;  %s583_s18 = smov 8  }
   0xd   :  { %34 = dma.hbm_to_vmem [thread:$0]  %s631_s1, 2048, %s29_s13, [#allocation7], %s582_s17, %s582_s17, %s583_s18  }
   0xe   :  { %s522_s21 = scalar_lea.vmem %s17_s15, 1024  ;;  %p527_p6 = scmp.lt.s32.totalorder %s17_s15, %s17_s15 }
   0xf   :  { %p523_p5 = scmp.ne.s32.totalorder %s17_s15, %s522_s21  ;;  %p528_p7 = scmp.lt.s32.totalorder %s522_s21, %s522_s21 }
  0x11   :  { %p529_p8 = por %p528_p7, %p527_p6 }
  0x13   :  { %p530_p9 = pnand %p529_p8, %p523_p5 }
  0x15   :  { %533 = shalt.err (!%p530_p9)
}
  0x16   :  { %22 = dma.hbm_to_vmem [thread:$0]  %s630_s0, 1024, %s17_s15, [#allocation4], %s582_s17, %s582_s17, %s583_s18  }
  0x17   :  { %s584_s24 = smov [#allocation8]  }
  0x18   :  { %s40_s25 = sshll.u32 %s584_s24, 4  ;;  %s41_s25 = int_to_ptr.vmem [resolvable:$true] %s40_s25 }
  0x19   :  { %s542_s26 = scalar_lea.vmem %s41_s25, 2048  ;;  %p547_p11 = scmp.lt.s32.totalorder %s41_s25, %s41_s25 }
  0x1a   :  { %p543_p10 = scmp.ne.s32.totalorder %s41_s25, %s542_s26  ;;  %p548_p12 = scmp.lt.s32.totalorder %s542_s26, %s542_s26 }
  0x1c   :  { %p549_p13 = por %p548_p12, %p547_p11 }
  0x1e   :  { %p550_p0 = pnand %p549_p13, %p543_p10 }
  0x20   :  { %553 = shalt.err (!%p550_p0)
}
  0x21   :  { %46 = dma.hbm_to_vmem [thread:$0]  %s632_s2, 2048, %s41_s25, [#allocation7], %s582_s17, %s582_s17, %s583_s18  }
  0x22   :  { %574 = dma.done.wait [#allocation4], 1024  }
  0x23   :  { %575 = vsyncadd [#allocation4], 4294966272 }
  0x24   :  { %576 = dma.done.wait [#allocation7], 4096  }
  0x25   :  { %577 = vsyncadd [#allocation7], 4294963200  ;;  %v83_v0 = vld [vmem:[#allocation6 + $0x78] sm:$0xff]  ;;  %v82_v1 = vld [vmem:[#allocation6 + $0x70] sm:$0xff]  ;;  %s585_s0 = smov [#allocation9]  }
  0x26   :  { %400 = vmatprep.subr.mxu0 %v83_v0  ;;  %v81_v2 = vld [vmem:[#allocation6 + $0x68] sm:$0xff]  ;;  %v80_v3 = vld [vmem:[#allocation6 + $0x60] sm:$0xff]  ;;  %v79_v5 = vld [vmem:[#allocation6 + $0x58] sm:$0xff]  ;;  %s339_s2 = sshll.u32 %s585_s0, 4  ;;  %s340_s2 = int_to_ptr.vmem [resolvable:$true] %s339_s2 }
  0x27   :  { %401 = vmatpush3.msra.mxu0 %v83_v0  ;;  %v60_v4 = vld [vmem:[#allocation3] sm:$0xff]  ;;  %v78_v6 = vld [vmem:[#allocation6 + $0x50] sm:$0xff]  ;;  %v220_v7 = vld [vmem:[#allocation8 + $0x78] sm:$0xff]  ;;  %s554_s28 = scalar_lea.vmem %s340_s2, 1024  ;;  %p559_p2 = scmp.lt.s32.totalorder %s340_s2, %s340_s2 }
  0x28   :  { %402 = vmatprep.subr.mxu0 %v82_v1  ;;  %432 = vmatprep.mubr.f32.mxu0 %v60_v4  ;;  %v219_v8 = vld [vmem:[#allocation8 + $0x70] sm:$0xff]  ;;  %v77_v9 = vld [vmem:[#allocation6 + $0x48] sm:$0xff]  ;;  %v76_v10 = vld [vmem:[#allocation6 + $0x40] sm:$0xff]  ;;  %p555_p1 = scmp.ne.s32.totalorder %s340_s2, %s554_s28  ;;  %p560_p3 = scmp.lt.s32.totalorder %s554_s28, %s554_s28 }
  0x29   :  { %403 = vmatpush3.msra.mxu0 %v82_v1  ;;  %444 = vmatprep.subr.mxu1 %v220_v7  ;;  %v218_v11 = vld [vmem:[#allocation8 + $0x68] sm:$0xff]  ;;  %v75_v12 = vld [vmem:[#allocation6 + $0x38] sm:$0xff]  ;;  %v74_v13 = vld [vmem:[#allocation6 + $0x30] sm:$0xff] }
  0x2a   :  { %404 = vmatprep.subr.mxu0 %v81_v2  ;;  %445 = vmatpush3.xpose.msra.mxu1 %v220_v7  ;;  %v217_v14 = vld [vmem:[#allocation8 + $0x60] sm:$0xff]  ;;  %v73_v15 = vld [vmem:[#allocation6 + $0x28] sm:$0xff]  ;;  %v216_v17 = vld [vmem:[#allocation8 + $0x58] sm:$0xff]  ;;  %p561_p4 = por %p560_p3, %p559_p2 }
  0x2b   :  { %405 = vmatpush3.msra.mxu0 %v81_v2  ;;  %446 = vmatprep.subr.mxu1 %v219_v8  ;;  %v72_v16 = vld [vmem:[#allocation6 + $0x20] sm:$0xff]  ;;  %v71_v18 = vld [vmem:[#allocation6 + $0x18] sm:$0xff]  ;;  %v70_v19 = vld [vmem:[#allocation6 + $0x10] sm:$0xff] }
  0x2c   :  { %406 = vmatprep.subr.mxu0 %v80_v3  ;;  %v215_v20 = vld [vmem:[#allocation8 + $0x50] sm:$0xff]  ;;  %v69_v21 = vld [vmem:[#allocation6 + $0x8] sm:$0xff]  ;;  %v68_v22 = vld [vmem:[#allocation6] sm:$0xff]  ;;  %p562_p5 = pnand %p561_p4, %p555_p1 }
  0x2d   :  { %407 = vmatpush3.msra.mxu0 %v80_v3  ;;  %v214_v23 = vld [vmem:[#allocation8 + $0x48] sm:$0xff]  ;;  %v62_v25 = vld [vmem:[#allocation3 + $0x10] sm:$0xff]  ;;  %v213_v26 = vld [vmem:[#allocation8 + $0x40] sm:$0xff] }
  0x2e   :  { %408 = vmatprep.subr.mxu0 %v79_v5  ;;  %447 = vmatpush3.xpose.msra.mxu1 %v219_v8  ;;  %v61_v24 = vld [vmem:[#allocation3 + $0x8] sm:$0xff]  ;;  %v63_v27 = vld [vmem:[#allocation3 + $0x18] sm:$0xff]  ;;  %v64_v28 = vld [vmem:[#allocation3 + $0x20] sm:$0xff] }
  0x2f   :  { %409 = vmatpush3.msra.mxu0 %v79_v5  ;;  %448 = vmatprep.subr.mxu1 %v218_v11  ;;  %v212_v29 = vld [vmem:[#allocation8 + $0x38] sm:$0xff]  ;;  %v65_v30 = vld [vmem:[#allocation3 + $0x28] sm:$0xff]  ;;  %v66_v31 = vld [vmem:[#allocation3 + $0x30] sm:$0xff] }
  0x30   :  { %410 = vmatprep.subr.mxu0 %v78_v6  ;;  %v211_v32 = vld [vmem:[#allocation8 + $0x30] sm:$0xff]  ;;  %v67_v33 = vld [vmem:[#allocation3 + $0x38] sm:$0xff]  ;;  %v210_v34 = vld [vmem:[#allocation8 + $0x28] sm:$0xff] }
  0x31   :  { %411 = vmatpush3.msra.mxu0 %v78_v6  ;;  %v209_v35 = vld [vmem:[#allocation8 + $0x20] sm:$0xff]  ;;  %v208_v36 = vld [vmem:[#allocation8 + $0x18] sm:$0xff]  ;;  %v207_v37 = vld [vmem:[#allocation8 + $0x10] sm:$0xff] }
  0x32   :  { %412 = vmatprep.subr.mxu0 %v77_v9  ;;  %449 = vmatpush3.xpose.msra.mxu1 %v218_v11  ;;  %v206_v38 = vld [vmem:[#allocation8 + $0x8] sm:$0xff]  ;;  %v205_v39 = vld [vmem:[#allocation8] sm:$0xff] }
  0x33   :  { %413 = vmatpush3.msra.mxu0 %v77_v9  ;;  %450 = vmatprep.subr.mxu1 %v217_v14 }
  0x34   :  { %414 = vmatprep.subr.mxu0 %v76_v10 }
  0x35   :  { %415 = vmatpush3.msra.mxu0 %v76_v10 }
  0x36   :  { %416 = vmatprep.subr.mxu0 %v75_v12  ;;  %451 = vmatpush3.xpose.msra.mxu1 %v217_v14 }
  0x37   :  { %417 = vmatpush3.msra.mxu0 %v75_v12  ;;  %452 = vmatprep.subr.mxu1 %v216_v17 }
  0x38   :  { %418 = vmatprep.subr.mxu0 %v74_v13 }
  0x39   :  { %419 = vmatpush3.msra.mxu0 %v74_v13 }
  0x3a   :  { %420 = vmatprep.subr.mxu0 %v73_v15  ;;  %453 = vmatpush3.xpose.msra.mxu1 %v216_v17 }
  0x3b   :  { %421 = vmatpush3.msra.mxu0 %v73_v15  ;;  %454 = vmatprep.subr.mxu1 %v215_v20 }
  0x3c   :  { %422 = vmatprep.subr.mxu0 %v72_v16 }
  0x3d   :  { %423 = vmatpush3.msra.mxu0 %v72_v16 }
  0x3e   :  { %424 = vmatprep.subr.mxu0 %v71_v18  ;;  %455 = vmatpush3.xpose.msra.mxu1 %v215_v20 }
  0x3f   :  { %425 = vmatpush3.msra.mxu0 %v71_v18  ;;  %456 = vmatprep.subr.mxu1 %v214_v23 }
  0x40   :  { %426 = vmatprep.subr.mxu0 %v70_v19 }
  0x41   :  { %427 = vmatpush3.msra.mxu0 %v70_v19 }
  0x42   :  { %428 = vmatprep.subr.mxu0 %v69_v21  ;;  %457 = vmatpush3.xpose.msra.mxu1 %v214_v23 }
  0x43   :  { %429 = vmatpush3.msra.mxu0 %v69_v21  ;;  %458 = vmatprep.subr.mxu1 %v213_v26 }
  0x44   :  { %430 = vmatprep.subr.mxu0 %v68_v22 }
  0x45   :  { %431 = vmatpush3.msra.mxu0 %v68_v22 }
  0x46   :  { %433 = vmatmul.mubr.f32.vlgmr.msra.gmra.mxu0 %v61_v24  ;;  %459 = vmatpush3.xpose.msra.mxu1 %v213_v26 }
  0x47   :  { %435 = vmatprep.mubr.f32.mxu0 %v62_v25  ;;  %460 = vmatprep.subr.mxu1 %v212_v29 }
  0x4a   :  { %436 = vmatmul.mubr.f32.gmra.mxu0 %v63_v27  ;;  %461 = vmatpush3.xpose.msra.mxu1 %v212_v29 }
  0x4b   :  { %438 = vmatprep.mubr.f32.mxu0 %v64_v28  ;;  %462 = vmatprep.subr.mxu1 %v211_v32 }
  0x4e   :  { %439 = vmatmul.mubr.f32.gmra.mxu0 %v65_v30  ;;  %463 = vmatpush3.xpose.msra.mxu1 %v211_v32 }
  0x4f   :  { %441 = vmatprep.mubr.f32.mxu0 %v66_v31  ;;  %464 = vmatprep.subr.mxu1 %v210_v34 }
  0x52   :  { %442 = vmatmul.mubr.f32.gmra.mxu0 %v67_v33  ;;  %465 = vmatpush3.xpose.msra.mxu1 %v210_v34 }
  0x53   :  { %466 = vmatprep.subr.mxu1 %v209_v35 }
  0x56   :  { %467 = vmatpush3.xpose.msra.mxu1 %v209_v35 }
  0x57   :  { %468 = vmatprep.subr.mxu1 %v208_v36 }
  0x5a   :  { %469 = vmatpush3.xpose.msra.mxu1 %v208_v36 }
  0x5b   :  { %470 = vmatprep.subr.mxu1 %v207_v37 }
  0x5e   :  { %471 = vmatpush3.xpose.msra.mxu1 %v207_v37 }
  0x5f   :  { %472 = vmatprep.subr.mxu1 %v206_v38 }
  0x62   :  { %473 = vmatpush3.xpose.msra.mxu1 %v206_v38 }
  0x63   :  { %474 = vmatprep.subr.mxu1 %v205_v39 }
  0x66   :  { %475 = vmatpush3.xpose.msra.mxu1 %v205_v39 }
 0x106   :  { %v434_v40 = vpop.f32.mrf.mxu0 }
 0x108   :  { %v150_v41 = vpop.f32.mrf.mxu0 }
 0x109   :  { %476 = vmatprep.mubr.f32.mxu1 %v150_v41 }
 0x10a   :  { %v437_v42 = vpop.f32.mrf.mxu0  ;;  %477 = vmatmul.mubr.f32.vlgmr.msra.gmra.mxu1 %v434_v40 }
 0x10c   :  { %v160_v43 = vpop.f32.mrf.mxu0 }
 0x10d   :  { %479 = vmatprep.mubr.f32.mxu1 %v160_v43 }
 0x10e   :  { %v440_v44 = vpop.f32.mrf.mxu0  ;;  %480 = vmatmul.mubr.f32.gmra.mxu1 %v437_v42 }
 0x110   :  { %v170_v45 = vpop.f32.mrf.mxu0 }
 0x111   :  { %482 = vmatprep.mubr.f32.mxu1 %v170_v45 }
 0x112   :  { %v443_v46 = vpop.f32.mrf.mxu0  ;;  %483 = vmatmul.mubr.f32.gmra.mxu1 %v440_v44 }
 0x114   :  { %v180_v47 = vpop.f32.mrf.mxu0 }
 0x115   :  { %485 = vmatprep.mubr.f32.mxu1 %v180_v47 }
 0x116   :  { %486 = vmatmul.mubr.f32.gmra.mxu1 %v443_v46 }
 0x1ca   :  { %v478_v48 = vpop.f32.mrf.mxu1 }
 0x1cb   :  { %327 = vst [vmem:[#allocation9 + $0x8] sm:$0xff] %v478_v48 }
 0x1cc   :  { %v287_v49 = vpop.f32.mrf.mxu1 }
 0x1cd   :  { %326 = vst [vmem:[#allocation9] sm:$0xff] %v287_v49 }
 0x1ce   :  { %v481_v50 = vpop.f32.mrf.mxu1 }
 0x1cf   :  { %329 = vst [vmem:[#allocation9 + $0x18] sm:$0xff] %v481_v50 }
 0x1d0   :  { %v297_v51 = vpop.f32.mrf.mxu1 }
 0x1d1   :  { %328 = vst [vmem:[#allocation9 + $0x10] sm:$0xff] %v297_v51 }
 0x1d2   :  { %v484_v52 = vpop.f32.mrf.mxu1 }
 0x1d3   :  { %331 = vst [vmem:[#allocation9 + $0x28] sm:$0xff] %v484_v52 }
 0x1d4   :  { %v307_v53 = vpop.f32.mrf.mxu1 }
 0x1d5   :  { %330 = vst [vmem:[#allocation9 + $0x20] sm:$0xff] %v307_v53 }
 0x1d6   :  { %v487_v54 = vpop.f32.mrf.mxu1 }
 0x1d7   :  { %333 = vst [vmem:[#allocation9 + $0x38] sm:$0xff] %v487_v54 }
 0x1d8   :  { %v317_v55 = vpop.f32.mrf.mxu1 }
 0x1d9   :  { %332 = vst [vmem:[#allocation9 + $0x30] sm:$0xff] %v317_v55 }
 0x1da   :  { %565 = shalt.err (!%p562_p5)
}
 0x1db   :  { %345 = dma.vmem_to_hbm [thread:$0]  %s340_s2, 1024, %s633_s3, [#allocation5], %s582_s17, %s582_s17, %s583_s18  }
 0x1dc   :  { %578 = dma.done.wait [#allocation5], 1024  }
 0x1dd   :  { %579 = vsyncadd [#allocation5], 4294966272 }
 0x1de   :  { %349 = vsyncpa [#allocation4], 1 }
 0x1df   :  { %350 = vsyncpa [#allocation7], 1 }
 0x1e0   :  { %351 = vsyncpa [#allocation5], 1 }

// kernel: tpu_custom_call.1
= control target key start
LH: loop header
LB: loop body
LE: loop exit
PB: predicated region body
PF: predicated region fallthrough
CT: control target
= control target key end

     0   :  { %8 = vsyncpa [#allocation4], 0  ;;  %s630_s0 = inlined_call_operand.hbm [shape: f32[64,128], index: 0, kind: input, shape index: {}]   ;;  %s631_s1 = inlined_call_operand.hbm [shape: f32[128,128], index: 1, kind: input, shape index: {}]   ;;  %s632_s2 = inlined_call_operand.hbm [shape: f32[128,128], index: 2, kind: input, shape index: {}]   ;;  %s633_s3 = inlined_call_operand.hbm [shape: f32[64,128], index: 3, kind: output, shape index: {}]  }
   0x1   :  { %9 = vsyncpa [#allocation7], 0 }
   0x2   :  { %10 = vsyncpa [#allocation5], 0  ;;  %s580_s12 = smov [#allocation6]   ;;  %s581_s14 = smov [#allocation3]  }
   0x3   :  { %s28_s13 = sshll.u32 %s580_s12, 4  ;;  %s16_s15 = sshll.u32 %s581_s14, 4  ;;  %s29_s13 = int_to_ptr.vmem [resolvable:$true] %s28_s13  ;;  %s17_s15 = int_to_ptr.vmem [resolvable:$true] %s16_s15 }
   0x4   :  { %s502_s16 = scalar_lea.vmem %s29_s13, 2048  ;;  %p507_p1 = scmp.lt.s32.totalorder %s29_s13, %s29_s13 }
   0x5   :  { %p503_p0 = scmp.ne.s32.totalorder %s29_s13, %s502_s16  ;;  %p508_p2 = scmp.lt.s32.totalorder %s502_s16, %s502_s16 }
   0x7   :  { %p509_p3 = por %p508_p2, %p507_p1 }
   0x9   :  { %p510_p4 = pnand %p509_p3, %p503_p0 }
   0xb   :  { %513 = shalt.err (!%p510_p4)
}
   0xc   :  { %s582_s17 = smov 128   ;;  %s583_s18 = smov 8  }
   0xd   :  { %34 = dma.hbm_to_vmem [thread:$0]  %s631_s1, 2048, %s29_s13, [#allocation7], %s582_s17, %s582_s17, %s583_s18  }
   0xe   :  { %s522_s21 = scalar_lea.vmem %s17_s15, 1024  ;;  %p527_p6 = scmp.lt.s32.totalorder %s17_s15, %s17_s15 }
   0xf   :  { %p523_p5 = scmp.ne.s32.totalorder %s17_s15, %s522_s21  ;;  %p528_p7 = scmp.lt.s32.totalorder %s522_s21, %s522_s21 }
  0x11   :  { %p529_p8 = por %p528_p7, %p527_p6 }
  0x13   :  { %p530_p9 = pnand %p529_p8, %p523_p5 }
  0x15   :  { %533 = shalt.err (!%p530_p9)
}
  0x16   :  { %22 = dma.hbm_to_vmem [thread:$0]  %s630_s0, 1024, %s17_s15, [#allocation4], %s582_s17, %s582_s17, %s583_s18  }
  0x17   :  { %s584_s24 = smov [#allocation8]  }
  0x18   :  { %s40_s25 = sshll.u32 %s584_s24, 4  ;;  %s41_s25 = int_to_ptr.vmem [resolvable:$true] %s40_s25 }
  0x19   :  { %s542_s26 = scalar_lea.vmem %s41_s25, 2048  ;;  %p547_p11 = scmp.lt.s32.totalorder %s41_s25, %s41_s25 }
  0x1a   :  { %p543_p10 = scmp.ne.s32.totalorder %s41_s25, %s542_s26  ;;  %p548_p12 = scmp.lt.s32.totalorder %s542_s26, %s542_s26 }
  0x1c   :  { %p549_p13 = por %p548_p12, %p547_p11 }
  0x1e   :  { %p550_p0 = pnand %p549_p13, %p543_p10 }
  0x20   :  { %553 = shalt.err (!%p550_p0)
}
  0x21   :  { %46 = dma.hbm_to_vmem [thread:$0]  %s632_s2, 2048, %s41_s25, [#allocation7], %s582_s17, %s582_s17, %s583_s18  }
  0x22   :  { %574 = dma.done.wait [#allocation4], 1024  }
  0x23   :  { %575 = vsyncadd [#allocation4], 4294966272 }
  0x24   :  { %576 = dma.done.wait [#allocation7], 4096  }
  0x25   :  { %577 = vsyncadd [#allocation7], 4294963200  ;;  %v83_v0 = vld [vmem:[#allocation6 + $0x78] sm:$0xff]  ;;  %v82_v1 = vld [vmem:[#allocation6 + $0x70] sm:$0xff]  ;;  %s585_s0 = smov [#allocation9]  }
  0x26   :  { %400 = vmatprep.subr.mxu0 %v83_v0  ;;  %v81_v2 = vld [vmem:[#allocation6 + $0x68] sm:$0xff]  ;;  %v80_v3 = vld [vmem:[#allocation6 + $0x60] sm:$0xff]  ;;  %v79_v5 = vld [vmem:[#allocation6 + $0x58] sm:$0xff]  ;;  %s339_s2 = sshll.u32 %s585_s0, 4  ;;  %s340_s2 = int_to_ptr.vmem [resolvable:$true] %s339_s2 }
  0x27   :  { %401 = vmatpush3.msra.mxu0 %v83_v0  ;;  %v60_v4 = vld [vmem:[#allocation3] sm:$0xff]  ;;  %v78_v6 = vld [vmem:[#allocation6 + $0x50] sm:$0xff]  ;;  %v220_v7 = vld [vmem:[#allocation8 + $0x78] sm:$0xff]  ;;  %s554_s28 = scalar_lea.vmem %s340_s2, 1024  ;;  %p559_p2 = scmp.lt.s32.totalorder %s340_s2, %s340_s2 }
  0x28   :  { %402 = vmatprep.subr.mxu0 %v82_v1  ;;  %432 = vmatprep.mubr.f32.mxu0 %v60_v4  ;;  %v219_v8 = vld [vmem:[#allocation8 + $0x70] sm:$0xff]  ;;  %v77_v9 = vld [vmem:[#allocation6 + $0x48] sm:$0xff]  ;;  %v76_v10 = vld [vmem:[#allocation6 + $0x40] sm:$0xff]  ;;  %p555_p1 = scmp.ne.s32.totalorder %s340_s2, %s554_s28  ;;  %p560_p3 = scmp.lt.s32.totalorder %s554_s28, %s554_s28 }
  0x29   :  { %403 = vmatpush3.msra.mxu0 %v82_v1  ;;  %444 = vmatprep.subr.mxu1 %v220_v7  ;;  %v218_v11 = vld [vmem:[#allocation8 + $0x68] sm:$0xff]  ;;  %v75_v12 = vld [vmem:[#allocation6 + $0x38] sm:$0xff]  ;;  %v74_v13 = vld [vmem:[#allocation6 + $0x30] sm:$0xff] }
  0x2a   :  { %404 = vmatprep.subr.mxu0 %v81_v2  ;;  %445 = vmatpush3.xpose.msra.mxu1 %v220_v7  ;;  %v217_v14 = vld [vmem:[#allocation8 + $0x60] sm:$0xff]  ;;  %v73_v15 = vld [vmem:[#allocation6 + $0x28] sm:$0xff]  ;;  %v216_v17 = vld [vmem:[#allocation8 + $0x58] sm:$0xff]  ;;  %p561_p4 = por %p560_p3, %p559_p2 }
  0x2b   :  { %405 = vmatpush3.msra.mxu0 %v81_v2  ;;  %446 = vmatprep.subr.mxu1 %v219_v8  ;;  %v72_v16 = vld [vmem:[#allocation6 + $0x20] sm:$0xff]  ;;  %v71_v18 = vld [vmem:[#allocation6 + $0x18] sm:$0xff]  ;;  %v70_v19 = vld [vmem:[#allocation6 + $0x10] sm:$0xff] }
  0x2c   :  { %406 = vmatprep.subr.mxu0 %v80_v3  ;;  %v215_v20 = vld [vmem:[#allocation8 + $0x50] sm:$0xff]  ;;  %v69_v21 = vld [vmem:[#allocation6 + $0x8] sm:$0xff]  ;;  %v68_v22 = vld [vmem:[#allocation6] sm:$0xff]  ;;  %p562_p5 = pnand %p561_p4, %p555_p1 }
  0x2d   :  { %407 = vmatpush3.msra.mxu0 %v80_v3  ;;  %v214_v23 = vld [vmem:[#allocation8 + $0x48] sm:$0xff]  ;;  %v62_v25 = vld [vmem:[#allocation3 + $0x10] sm:$0xff]  ;;  %v213_v26 = vld [vmem:[#allocation8 + $0x40] sm:$0xff] }
  0x2e   :  { %408 = vmatprep.subr.mxu0 %v79_v5  ;;  %447 = vmatpush3.xpose.msra.mxu1 %v219_v8  ;;  %v61_v24 = vld [vmem:[#allocation3 + $0x8] sm:$0xff]  ;;  %v63_v27 = vld [vmem:[#allocation3 + $0x18] sm:$0xff]  ;;  %v64_v28 = vld [vmem:[#allocation3 + $0x20] sm:$0xff] }
  0x2f   :  { %409 = vmatpush3.msra.mxu0 %v79_v5  ;;  %448 = vmatprep.subr.mxu1 %v218_v11  ;;  %v212_v29 = vld [vmem:[#allocation8 + $0x38] sm:$0xff]  ;;  %v65_v30 = vld [vmem:[#allocation3 + $0x28] sm:$0xff]  ;;  %v66_v31 = vld [vmem:[#allocation3 + $0x30] sm:$0xff] }
  0x30   :  { %410 = vmatprep.subr.mxu0 %v78_v6  ;;  %v211_v32 = vld [vmem:[#allocation8 + $0x30] sm:$0xff]  ;;  %v67_v33 = vld [vmem:[#allocation3 + $0x38] sm:$0xff]  ;;  %v210_v34 = vld [vmem:[#allocation8 + $0x28] sm:$0xff] }
  0x31   :  { %411 = vmatpush3.msra.mxu0 %v78_v6  ;;  %v209_v35 = vld [vmem:[#allocation8 + $0x20] sm:$0xff]  ;;  %v208_v36 = vld [vmem:[#allocation8 + $0x18] sm:$0xff]  ;;  %v207_v37 = vld [vmem:[#allocation8 + $0x10] sm:$0xff] }
  0x32   :  { %412 = vmatprep.subr.mxu0 %v77_v9  ;;  %449 = vmatpush3.xpose.msra.mxu1 %v218_v11  ;;  %v206_v38 = vld [vmem:[#allocation8 + $0x8] sm:$0xff]  ;;  %v205_v39 = vld [vmem:[#allocation8] sm:$0xff] }
  0x33   :  { %413 = vmatpush3.msra.mxu0 %v77_v9  ;;  %450 = vmatprep.subr.mxu1 %v217_v14 }
  0x34   :  { %414 = vmatprep.subr.mxu0 %v76_v10 }
  0x35   :  { %415 = vmatpush3.msra.mxu0 %v76_v10 }
  0x36   :  { %416 = vmatprep.subr.mxu0 %v75_v12  ;;  %451 = vmatpush3.xpose.msra.mxu1 %v217_v14 }
  0x37   :  { %417 = vmatpush3.msra.mxu0 %v75_v12  ;;  %452 = vmatprep.subr.mxu1 %v216_v17 }
  0x38   :  { %418 = vmatprep.subr.mxu0 %v74_v13 }
  0x39   :  { %419 = vmatpush3.msra.mxu0 %v74_v13 }
  0x3a   :  { %420 = vmatprep.subr.mxu0 %v73_v15  ;;  %453 = vmatpush3.xpose.msra.mxu1 %v216_v17 }
  0x3b   :  { %421 = vmatpush3.msra.mxu0 %v73_v15  ;;  %454 = vmatprep.subr.mxu1 %v215_v20 }
  0x3c   :  { %422 = vmatprep.subr.mxu0 %v72_v16 }
  0x3d   :  { %423 = vmatpush3.msra.mxu0 %v72_v16 }
  0x3e   :  { %424 = vmatprep.subr.mxu0 %v71_v18  ;;  %455 = vmatpush3.xpose.msra.mxu1 %v215_v20 }
  0x3f   :  { %425 = vmatpush3.msra.mxu0 %v71_v18  ;;  %456 = vmatprep.subr.mxu1 %v214_v23 }
  0x40   :  { %426 = vmatprep.subr.mxu0 %v70_v19 }
  0x41   :  { %427 = vmatpush3.msra.mxu0 %v70_v19 }
  0x42   :  { %428 = vmatprep.subr.mxu0 %v69_v21  ;;  %457 = vmatpush3.xpose.msra.mxu1 %v214_v23 }
  0x43   :  { %429 = vmatpush3.msra.mxu0 %v69_v21  ;;  %458 = vmatprep.subr.mxu1 %v213_v26 }
  0x44   :  { %430 = vmatprep.subr.mxu0 %v68_v22 }
  0x45   :  { %431 = vmatpush3.msra.mxu0 %v68_v22 }
  0x46   :  { %433 = vmatmul.mubr.f32.vlgmr.msra.gmra.mxu0 %v61_v24  ;;  %459 = vmatpush3.xpose.msra.mxu1 %v213_v26 }
  0x47   :  { %435 = vmatprep.mubr.f32.mxu0 %v62_v25  ;;  %460 = vmatprep.subr.mxu1 %v212_v29 }
  0x4a   :  { %436 = vmatmul.mubr.f32.gmra.mxu0 %v63_v27  ;;  %461 = vmatpush3.xpose.msra.mxu1 %v212_v29 }
  0x4b   :  { %438 = vmatprep.mubr.f32.mxu0 %v64_v28  ;;  %462 = vmatprep.subr.mxu1 %v211_v32 }
  0x4e   :  { %439 = vmatmul.mubr.f32.gmra.mxu0 %v65_v30  ;;  %463 = vmatpush3.xpose.msra.mxu1 %v211_v32 }
  0x4f   :  { %441 = vmatprep.mubr.f32.mxu0 %v66_v31  ;;  %464 = vmatprep.subr.mxu1 %v210_v34 }
  0x52   :  { %442 = vmatmul.mubr.f32.gmra.mxu0 %v67_v33  ;;  %465 = vmatpush3.xpose.msra.mxu1 %v210_v34 }
  0x53   :  { %466 = vmatprep.subr.mxu1 %v209_v35 }
  0x56   :  { %467 = vmatpush3.xpose.msra.mxu1 %v209_v35 }
  0x57   :  { %468 = vmatprep.subr.mxu1 %v208_v36 }
  0x5a   :  { %469 = vmatpush3.xpose.msra.mxu1 %v208_v36 }
  0x5b   :  { %470 = vmatprep.subr.mxu1 %v207_v37 }
  0x5e   :  { %471 = vmatpush3.xpose.msra.mxu1 %v207_v37 }
  0x5f   :  { %472 = vmatprep.subr.mxu1 %v206_v38 }
  0x62   :  { %473 = vmatpush3.xpose.msra.mxu1 %v206_v38 }
  0x63   :  { %474 = vmatprep.subr.mxu1 %v205_v39 }
  0x66   :  { %475 = vmatpush3.xpose.msra.mxu1 %v205_v39 }
 0x106   :  { %v434_v40 = vpop.f32.mrf.mxu0 }
 0x108   :  { %v150_v41 = vpop.f32.mrf.mxu0 }
 0x109   :  { %476 = vmatprep.mubr.f32.mxu1 %v150_v41 }
 0x10a   :  { %v437_v42 = vpop.f32.mrf.mxu0  ;;  %477 = vmatmul.mubr.f32.vlgmr.msra.gmra.mxu1 %v434_v40 }
 0x10c   :  { %v160_v43 = vpop.f32.mrf.mxu0 }
 0x10d   :  { %479 = vmatprep.mubr.f32.mxu1 %v160_v43 }
 0x10e   :  { %v440_v44 = vpop.f32.mrf.mxu0  ;;  %480 = vmatmul.mubr.f32.gmra.mxu1 %v437_v42 }
 0x110   :  { %v170_v45 = vpop.f32.mrf.mxu0 }
 0x111   :  { %482 = vmatprep.mubr.f32.mxu1 %v170_v45 }
 0x112   :  { %v443_v46 = vpop.f32.mrf.mxu0  ;;  %483 = vmatmul.mubr.f32.gmra.mxu1 %v440_v44 }
 0x114   :  { %v180_v47 = vpop.f32.mrf.mxu0 }
 0x115   :  { %485 = vmatprep.mubr.f32.mxu1 %v180_v47 }
 0x116   :  { %486 = vmatmul.mubr.f32.gmra.mxu1 %v443_v46 }
 0x1ca   :  { %v478_v48 = vpop.f32.mrf.mxu1 }
 0x1cb   :  { %327 = vst [vmem:[#allocation9 + $0x8] sm:$0xff] %v478_v48 }
 0x1cc   :  { %v287_v49 = vpop.f32.mrf.mxu1 }
 0x1cd   :  { %326 = vst [vmem:[#allocation9] sm:$0xff] %v287_v49 }
 0x1ce   :  { %v481_v50 = vpop.f32.mrf.mxu1 }
 0x1cf   :  { %329 = vst [vmem:[#allocation9 + $0x18] sm:$0xff] %v481_v50 }
 0x1d0   :  { %v297_v51 = vpop.f32.mrf.mxu1 }
 0x1d1   :  { %328 = vst [vmem:[#allocation9 + $0x10] sm:$0xff] %v297_v51 }
 0x1d2   :  { %v484_v52 = vpop.f32.mrf.mxu1 }
 0x1d3   :  { %331 = vst [vmem:[#allocation9 + $0x28] sm:$0xff] %v484_v52 }
 0x1d4   :  { %v307_v53 = vpop.f32.mrf.mxu1 }
 0x1d5   :  { %330 = vst [vmem:[#allocation9 + $0x20] sm:$0xff] %v307_v53 }
 0x1d6   :  { %v487_v54 = vpop.f32.mrf.mxu1 }
 0x1d7   :  { %333 = vst [vmem:[#allocation9 + $0x38] sm:$0xff] %v487_v54 }
 0x1d8   :  { %v317_v55 = vpop.f32.mrf.mxu1 }
 0x1d9   :  { %332 = vst [vmem:[#allocation9 + $0x30] sm:$0xff] %v317_v55 }
 0x1da   :  { %565 = shalt.err (!%p562_p5)
}
 0x1db   :  { %345 = dma.vmem_to_hbm [thread:$0]  %s340_s2, 1024, %s633_s3, [#allocation5], %s582_s17, %s582_s17, %s583_s18  }
 0x1dc   :  { %578 = dma.done.wait [#allocation5], 1024  }
 0x1dd   :  { %579 = vsyncadd [#allocation5], 4294966272 }
 0x1de   :  { %349 = vsyncpa [#allocation4], 1 }
 0x1df   :  { %350 = vsyncpa [#allocation7], 1 }
 0x1e0   :  { %351 = vsyncpa [#allocation5], 1 }

</bundles_post_ra>
